<compile_context>
chip_gen: v5e
topology: v5e:2x2
jax: 0.10.0
libtpu: 0.0.40
codegen_flags: <defaults>
</compile_context>

<pallas_src>
import jax
import jax.numpy as jnp
from jax.experimental import pallas as pl
from jax.experimental.pallas import tpu as pltpu

HPAD = 64           # hidden dim 50 zero-padded to 64 (half a vreg lane width)
LANES = 2 * HPAD    # 128 lanes = two packed batch rows


def _cdiv(a, b):
    return -(-a // b)


def _round_up(n, m):
    return _cdiv(n, m) * m


def _mlp_kernel(x_ref, rv_ref, w2_ref, w3_ref, w4_ref, o_ref):
    """Fused MLP on a tile of packed batch rows.

    x_ref:  (bm2, 2)      column 0 = batch row 2i, column 1 = batch row 2i+1
    rv_ref: (8, 128) f32  row-vector params:
              0: [w1|w1]  1: [b1|b1]  2: [b2|b2]  3: [b3|b3]  4: [b4|b4]
              5: [w5|0]   6: [0|w5]   7: b5 replicated
    w2..w4: (128, 128)    block-diagonal diag(W_64, W_64), f32 or bf16
    o_ref:  (bm2, 2)      column 0 = y[2i], column 1 = y[2i+1]
    """
    bm2 = x_ref.shape[0]
    rv = rv_ref[...]
    w1p = rv[0:1, :]
    b1p = rv[1:2, :]
    b2p = rv[2:3, :]
    b3p = rv[3:4, :]
    b4p = rv[4:5, :]
    w5e = rv[5:6, :]
    w5o = rv[6:7, :]
    b5 = rv[7:8, 0:1]                                        # (1, 1)

    x2 = x_ref[...].astype(jnp.float32)                      # (bm2, 2)
    xe = x2[:, 0:1]                                          # batch rows 2i
    xo = x2[:, 1:2]                                          # batch rows 2i+1

    # Layer 1 (K=1): lane-select the right x for each half, then VPU fma + EUP.
    lane = jax.lax.broadcasted_iota(jnp.int32, (bm2, LANES), 1)
    xb = jnp.where(lane < HPAD, xe, xo)                      # (bm2, 128)
    h = jnp.tanh(xb * w1p + b1p)

    # Layers 2-4: block-diagonal 128x128 matmuls on the MXU (bf16 by default).
    mm_dt = w2_ref.dtype
    h = jnp.tanh(
        jnp.dot(h.astype(mm_dt), w2_ref[...],
                preferred_element_type=jnp.float32) + b2p)
    h = jnp.tanh(
        jnp.dot(h.astype(mm_dt), w3_ref[...],
                preferred_element_type=jnp.float32) + b3p)
    h = jnp.tanh(
        jnp.dot(h.astype(mm_dt), w4_ref[...],
                preferred_element_type=jnp.float32) + b4p)

    # Layer 5 (N=1): VPU multiply + two XLU lane reduces (even / odd halves).
    ye = jnp.sum(h * w5e, axis=-1, keepdims=True) + b5       # (bm2, 1) -> y[2i]
    yo = jnp.sum(h * w5o, axis=-1, keepdims=True) + b5       # (bm2, 1) -> y[2i+1]

    o_ref[...] = jnp.concatenate([ye, yo], axis=-1).astype(o_ref.dtype)


def pack_params(params, matmul_dtype=jnp.bfloat16):
    """Pack PyTorch-layout params ((in,out) weights, (1,out) biases) into
    the kernel's 2-rows-per-vreg layout."""
    w1, b1, w2, b2, w3, b3, w4, b4, w5, b5 = params
    assert w1.shape[0] == 1, "kernel assumes input_dim == 1"
    assert w5.shape[1] == 1, "kernel assumes output_dim == 1"
    hidden = w1.shape[1]
    assert hidden <= HPAD, "hidden dim must fit in 64 lanes"

    def pad_row(v):                         # (1, h) -> (1, HPAD)
        v = v.reshape(1, -1).astype(jnp.float32)
        return jnp.pad(v, ((0, 0), (0, HPAD - v.shape[1])))

    w1r = pad_row(w1)
    b1r, b2r, b3r, b4r = pad_row(b1), pad_row(b2), pad_row(b3), pad_row(b4)
    w5r = pad_row(w5.T)
    z = jnp.zeros((1, HPAD), jnp.float32)

    rv = jnp.concatenate([
        jnp.concatenate([w1r, w1r], axis=1),                 # row 0
        jnp.concatenate([b1r, b1r], axis=1),                 # row 1
        jnp.concatenate([b2r, b2r], axis=1),                 # row 2
        jnp.concatenate([b3r, b3r], axis=1),                 # row 3
        jnp.concatenate([b4r, b4r], axis=1),                 # row 4
        jnp.concatenate([w5r, z], axis=1),                   # row 5
        jnp.concatenate([z, w5r], axis=1),                   # row 6
        jnp.broadcast_to(b5.reshape(1, 1).astype(jnp.float32), (1, LANES)),
    ], axis=0)                                               # (8, 128) f32

    def blkdiag(w):                          # (h,h) -> block-diag (128,128)
        wp = jnp.pad(w.astype(jnp.float32),
                     ((0, HPAD - w.shape[0]), (0, HPAD - w.shape[1])))
        zz = jnp.zeros_like(wp)
        top = jnp.concatenate([wp, zz], axis=1)
        bot = jnp.concatenate([zz, wp], axis=1)
        return jnp.concatenate([top, bot], axis=0).astype(matmul_dtype)

    return rv, blkdiag(w2), blkdiag(w3), blkdiag(w4)


def neural_network_forward(x, params, *, block_batch=4096,
                           matmul_dtype=jnp.bfloat16):
    """Run the fused MLP Pallas kernel.

    x:      (batch, 1) float32
    params: (w1, b1, ..., w5, b5), weights in (in_dim, out_dim) layout,
            biases (1, out_dim), hidden_dim <= 64 (50 for the reference module).
    """
    B, in_dim = x.shape
    assert in_dim == 1, "module spec has input_dim == 1"

    rv, w2p, w3p, w4p = pack_params(params, matmul_dtype)

    # Tile-count selection: minimise padding waste; force >= 2 "parallel"
    # steps for largish single-tile batches so v7x's 2 TensorCores both work.
    n_tiles = max(1, _cdiv(B, block_batch))
    if n_tiles == 1 and B >= 1024:
        n_tiles = 2
    bm = _round_up(_cdiv(B, n_tiles), 16)   # batch rows per tile (even, /16)
    b_pad = n_tiles * bm
    if b_pad != B:
        x = jnp.pad(x, ((0, b_pad - B), (0, 0)))

    x_packed = x.reshape(b_pad // 2, 2)     # row i = [x[2i], x[2i+1]] (free)
    bm2 = bm // 2

    const_map = lambda i: (0, 0)
    out = pl.pallas_call(
        _mlp_kernel,
        out_shape=jax.ShapeDtypeStruct((b_pad // 2, 2), x.dtype),
        grid=(n_tiles,),
        in_specs=[
            pl.BlockSpec((bm2, 2), lambda i: (i, 0)),        # packed x
            pl.BlockSpec((8, LANES), const_map),             # row-vector params
            pl.BlockSpec((LANES, LANES), const_map),         # W2 (block-diag)
            pl.BlockSpec((LANES, LANES), const_map),         # W3
            pl.BlockSpec((LANES, LANES), const_map),         # W4
        ],
        out_specs=pl.BlockSpec((bm2, 2), lambda i: (i, 0)),
        compiler_params=pltpu.CompilerParams(
            dimension_semantics=("parallel",)),               # 2-TC sharding on v7x
    )(x_packed, rv, w2p, w3p, w4p)

    return out.reshape(b_pad, 1)[:B]


def init_params(key, input_dim=1, hidden_dim=50, output_dim=1):
    """Deterministic init mimicking PyTorch nn.Linear default
    (uniform(-1/sqrt(fan_in), 1/sqrt(fan_in)))."""
    dims = [input_dim, hidden_dim, hidden_dim, hidden_dim, hidden_dim, output_dim]
    params = []
    for i in range(5):
        fan_in, fan_out = dims[i], dims[i + 1]
        key, kw, kb = jax.random.split(key, 3)
        bound = 1.0 / (fan_in ** 0.5)
        w = jax.random.uniform(kw, (fan_in, fan_out), jnp.float32, -bound, bound)
        b = jax.random.uniform(kb, (1, fan_out), jnp.float32, -bound, bound)
        params.extend([w, b])
    return tuple(params)


def reference_forward(x, params):
    """Pure-JAX reference (unpadded params) for correctness checking."""
    h = x
    for i in range(4):
        w, b = params[2 * i], params[2 * i + 1]
        h = jnp.tanh(h @ w + b)
    return h @ params[8] + params[9]


if __name__ == "__main__":
    key = jax.random.PRNGKey(0)
    key, kx1, kx2 = jax.random.split(key, 3)

    params = init_params(key, input_dim=1, hidden_dim=50, output_dim=1)

    # Small batch, f32 matmuls, single grid step.
    batch = 8
    x = jax.random.normal(kx1, (batch, 1), jnp.float32)
    out = jax.block_until_ready(
        neural_network_forward(x, params, matmul_dtype=jnp.float32))
    ref = reference_forward(x, params)
    assert out.shape == (batch, 1)
    assert jnp.allclose(out, ref, atol=2e-5, rtol=2e-5), "mismatch (batch=8, f32)"

    # Larger odd batch: exercises batch padding + a multi-step grid.
    batch2 = 301
    x2 = jax.random.normal(kx2, (batch2, 1), jnp.float32)
    ref2 = reference_forward(x2, params)

    out_f32 = jax.block_until_ready(
        neural_network_forward(x2, params, matmul_dtype=jnp.float32,
                               block_batch=128))              # 3 grid steps
    assert out_f32.shape == (batch2, 1)
    assert jnp.allclose(out_f32, ref2, atol=2e-5, rtol=2e-5), \
        "mismatch (batch=301, f32, multi-tile)"

    # Default (bf16 MXU) path: accuracy tradeoff, relaxed tolerance.
    out_bf16 = jax.block_until_ready(neural_network_forward(x2, params))
    assert out_bf16.shape == (batch2, 1)
    assert jnp.allclose(out_bf16, ref2, atol=5e-2, rtol=5e-2), \
        "mismatch (batch=301, bf16 matmul)"

    print("KERNEL_OK")
</pallas_src>

<mosaic_0001>
module attributes {stable_mosaic.version = 11 : i64} {
  func.func @_mlp_kernel(%arg0: i32, %arg1: memref<8x2xf32, #tpu.memory_space<vmem>>, %arg2: memref<8x128xf32, #tpu.memory_space<vmem>>, %arg3: memref<128x128xf32, #tpu.memory_space<vmem>>, %arg4: memref<128x128xf32, #tpu.memory_space<vmem>>, %arg5: memref<128x128xf32, #tpu.memory_space<vmem>>, %arg6: memref<8x2xf32, #tpu.memory_space<vmem>>) attributes {dimension_semantics = [#tpu.dimension_semantics<parallel>], iteration_bounds = array<i64: 1>, scalar_prefetch = 0 : i64, scratch_operands = 0 : i64, tpu.core_type = #tpu.core_type<tc>, window_params = [{transform_indices = @transform_0, window_bounds = array<i64: 8, 2>}, {pipeline_mode = #tpu.pipeline_mode<synchronous>, transform_indices = @transform_1, window_bounds = array<i64: 8, 128>}, {pipeline_mode = #tpu.pipeline_mode<synchronous>, transform_indices = @transform_2, window_bounds = array<i64: 128, 128>}, {pipeline_mode = #tpu.pipeline_mode<synchronous>, transform_indices = @transform_3, window_bounds = array<i64: 128, 128>}, {pipeline_mode = #tpu.pipeline_mode<synchronous>, transform_indices = @transform_4, window_bounds = array<i64: 128, 128>}, {transform_indices = @transform_5, window_bounds = array<i64: 8, 2>}]} {
    %c0 = arith.constant 0 : index
    %c0_0 = arith.constant 0 : index
    %0 = vector.load %arg2[%c0, %c0_0] : memref<8x128xf32, #tpu.memory_space<vmem>>, vector<8x128xf32>
    %1 = vector.extract_strided_slice %0 {offsets = [0, 0], sizes = [1, 128], strides = [1, 1]} : vector<8x128xf32> to vector<1x128xf32>
    %2 = vector.extract_strided_slice %0 {offsets = [1, 0], sizes = [1, 128], strides = [1, 1]} : vector<8x128xf32> to vector<1x128xf32>
    %3 = vector.extract_strided_slice %0 {offsets = [2, 0], sizes = [1, 128], strides = [1, 1]} : vector<8x128xf32> to vector<1x128xf32>
    %4 = vector.extract_strided_slice %0 {offsets = [3, 0], sizes = [1, 128], strides = [1, 1]} : vector<8x128xf32> to vector<1x128xf32>
    %5 = vector.extract_strided_slice %0 {offsets = [4, 0], sizes = [1, 128], strides = [1, 1]} : vector<8x128xf32> to vector<1x128xf32>
    %6 = vector.extract_strided_slice %0 {offsets = [5, 0], sizes = [1, 128], strides = [1, 1]} : vector<8x128xf32> to vector<1x128xf32>
    %7 = vector.extract_strided_slice %0 {offsets = [6, 0], sizes = [1, 128], strides = [1, 1]} : vector<8x128xf32> to vector<1x128xf32>
    %8 = vector.extract_strided_slice %0 {offsets = [7, 0], sizes = [1, 1], strides = [1, 1]} : vector<8x128xf32> to vector<1x1xf32>
    %c0_1 = arith.constant 0 : index
    %c0_2 = arith.constant 0 : index
    %9 = vector.load %arg1[%c0_1, %c0_2] : memref<8x2xf32, #tpu.memory_space<vmem>>, vector<8x2xf32>
    %10 = vector.extract_strided_slice %9 {offsets = [0, 0], sizes = [8, 1], strides = [1, 1]} : vector<8x2xf32> to vector<8x1xf32>
    %11 = vector.extract_strided_slice %9 {offsets = [0, 1], sizes = [8, 1], strides = [1, 1]} : vector<8x2xf32> to vector<8x1xf32>
    %12 = tpu.iota {dimensions = array<i32: 1>} : vector<8x128xi32>
    %c64_i32 = arith.constant 64 : i32
    %13 = vector.broadcast %c64_i32 : i32 to vector<8x128xi32>
    %14 = arith.cmpi slt, %12, %13 : vector<8x128xi32>
    %15 = vector.shape_cast %10 : vector<8x1xf32> to vector<8x1xf32>
    %16 = vector.broadcast %15 : vector<8x1xf32> to vector<8x128xf32>
    %17 = vector.shape_cast %11 : vector<8x1xf32> to vector<8x1xf32>
    %18 = vector.broadcast %17 : vector<8x1xf32> to vector<8x128xf32>
    %19 = arith.select %14, %16, %18 : vector<8x128xi1>, vector<8x128xf32>
    %20 = vector.broadcast %1 : vector<1x128xf32> to vector<8x128xf32>
    %21 = arith.mulf %19, %20 : vector<8x128xf32>
    %22 = vector.broadcast %2 : vector<1x128xf32> to vector<8x128xf32>
    %23 = arith.addf %21, %22 : vector<8x128xf32>
    %24 = math.tanh %23 : vector<8x128xf32>
    %c0_3 = arith.constant 0 : index
    %c0_4 = arith.constant 0 : index
    %25 = vector.load %arg3[%c0_3, %c0_4] : memref<128x128xf32, #tpu.memory_space<vmem>>, vector<128x128xf32>
    %cst = arith.constant dense<0.000000e+00> : vector<8x128xf32>
    %26 = tpu.matmul %24, %25, %cst {dimension_numbers = #tpu.dot_dimension_numbers<[1], [0], [0], [1], [0, 0, 1, 1], [], []>} : vector<8x128xf32>, vector<128x128xf32>, vector<8x128xf32> -> vector<8x128xf32>
    %27 = vector.broadcast %3 : vector<1x128xf32> to vector<8x128xf32>
    %28 = arith.addf %26, %27 : vector<8x128xf32>
    %29 = math.tanh %28 : vector<8x128xf32>
    %c0_5 = arith.constant 0 : index
    %c0_6 = arith.constant 0 : index
    %30 = vector.load %arg4[%c0_5, %c0_6] : memref<128x128xf32, #tpu.memory_space<vmem>>, vector<128x128xf32>
    %cst_7 = arith.constant dense<0.000000e+00> : vector<8x128xf32>
    %31 = tpu.matmul %29, %30, %cst_7 {dimension_numbers = #tpu.dot_dimension_numbers<[1], [0], [0], [1], [0, 0, 1, 1], [], []>} : vector<8x128xf32>, vector<128x128xf32>, vector<8x128xf32> -> vector<8x128xf32>
    %32 = vector.broadcast %4 : vector<1x128xf32> to vector<8x128xf32>
    %33 = arith.addf %31, %32 : vector<8x128xf32>
    %34 = math.tanh %33 : vector<8x128xf32>
    %c0_8 = arith.constant 0 : index
    %c0_9 = arith.constant 0 : index
    %35 = vector.load %arg5[%c0_8, %c0_9] : memref<128x128xf32, #tpu.memory_space<vmem>>, vector<128x128xf32>
    %cst_10 = arith.constant dense<0.000000e+00> : vector<8x128xf32>
    %36 = tpu.matmul %34, %35, %cst_10 {dimension_numbers = #tpu.dot_dimension_numbers<[1], [0], [0], [1], [0, 0, 1, 1], [], []>} : vector<8x128xf32>, vector<128x128xf32>, vector<8x128xf32> -> vector<8x128xf32>
    %37 = vector.broadcast %5 : vector<1x128xf32> to vector<8x128xf32>
    %38 = arith.addf %36, %37 : vector<8x128xf32>
    %39 = math.tanh %38 : vector<8x128xf32>
    %40 = vector.broadcast %6 : vector<1x128xf32> to vector<8x128xf32>
    %41 = arith.mulf %39, %40 : vector<8x128xf32>
    %cst_11 = arith.constant dense<0.000000e+00> : vector<8xf32>
    %42 = vector.multi_reduction <add>, %41, %cst_11 [1] : vector<8x128xf32> to vector<8xf32>
    %43 = vector.shape_cast %42 : vector<8xf32> to vector<8x1xf32>
    %44 = vector.broadcast %8 : vector<1x1xf32> to vector<8x1xf32>
    %45 = arith.addf %43, %44 : vector<8x1xf32>
    %46 = vector.broadcast %7 : vector<1x128xf32> to vector<8x128xf32>
    %47 = arith.mulf %39, %46 : vector<8x128xf32>
    %cst_12 = arith.constant dense<0.000000e+00> : vector<8xf32>
    %48 = vector.multi_reduction <add>, %47, %cst_12 [1] : vector<8x128xf32> to vector<8xf32>
    %49 = vector.shape_cast %48 : vector<8xf32> to vector<8x1xf32>
    %50 = vector.broadcast %8 : vector<1x1xf32> to vector<8x1xf32>
    %51 = arith.addf %49, %50 : vector<8x1xf32>
    %52 = tpu.concatenate %45, %51 in 1 : vector<8x1xf32>, vector<8x1xf32> -> vector<8x2xf32>
    %c0_13 = arith.constant 0 : index
    %c0_14 = arith.constant 0 : index
    %53 = vector.load %arg6[%c0_13, %c0_14] : memref<8x2xf32, #tpu.memory_space<vmem>>, vector<8x2xf32>
    tpu.vector_store %arg6[%c0_13, %c0_14], %52 {strides = array<i32>} : memref<8x2xf32, #tpu.memory_space<vmem>>, vector<8x2xf32>,
    return
  }
  func.func @transform_0(%arg0: i32) -> (i32, i32) {
    %c0_i32 = arith.constant 0 : i32
    %c0_i32_0 = arith.constant 0 : i32
    return %arg0, %c0_i32 : i32, i32
  }
  func.func @transform_1(%arg0: i32) -> (i32, i32) {
    %c0_i32 = arith.constant 0 : i32
    %c0_i32_0 = arith.constant 0 : i32
    %c0_i32_1 = arith.constant 0 : i32
    return %c0_i32, %c0_i32_0 : i32, i32
  }
  func.func @transform_2(%arg0: i32) -> (i32, i32) {
    %c0_i32 = arith.constant 0 : i32
    %c0_i32_0 = arith.constant 0 : i32
    %c0_i32_1 = arith.constant 0 : i32
    return %c0_i32, %c0_i32_0 : i32, i32
  }
  func.func @transform_3(%arg0: i32) -> (i32, i32) {
    %c0_i32 = arith.constant 0 : i32
    %c0_i32_0 = arith.constant 0 : i32
    %c0_i32_1 = arith.constant 0 : i32
    return %c0_i32, %c0_i32_0 : i32, i32
  }
  func.func @transform_4(%arg0: i32) -> (i32, i32) {
    %c0_i32 = arith.constant 0 : i32
    %c0_i32_0 = arith.constant 0 : i32
    %c0_i32_1 = arith.constant 0 : i32
    return %c0_i32, %c0_i32_0 : i32, i32
  }
  func.func @transform_5(%arg0: i32) -> (i32, i32) {
    %c0_i32 = arith.constant 0 : i32
    %c0_i32_0 = arith.constant 0 : i32
    return %arg0, %c0_i32 : i32, i32
  }
}

</mosaic_0001>

<bundles_post_ra>
// kernel: tpu_custom_call.1
= control target key start
LH: loop header
LB: loop body
LE: loop exit
PB: predicated region body
PF: predicated region fallthrough
CT: control target
= control target key end

     0   :  { %10 = vsyncpa [#allocation3], 0  ;;  %s386_s0 = inlined_call_operand.vmem [shape: f32[8,2], index: 0, kind: input, shape index: {}]   ;;  %s387_s1 = inlined_call_operand.vmem [shape: f32[8,128], index: 1, kind: input, shape index: {}]   ;;  %s388_s2 = inlined_call_operand.hbm [shape: f32[128,128], index: 2, kind: input, shape index: {}]   ;;  %s389_s3 = inlined_call_operand.hbm [shape: f32[128,128], index: 3, kind: input, shape index: {}]   ;;  %s390_s4 = inlined_call_operand.hbm [shape: f32[128,128], index: 4, kind: input, shape index: {}]   ;;  %s391_s5 = inlined_call_operand.vmem [shape: f32[8,2], index: 5, kind: output, shape index: {}]  }
   0x1   :  { %11 = vsyncpa [#allocation5], 0  ;;  %s33_s20 = sshll.u32 %s389_s3, 4  ;;  %s320_s21 = smov [#allocation4]   ;;  %s34_s20 = int_to_ptr.hbm [resolvable:$true] %s33_s20 }
   0x2   :  { %s35_s22 = sshll.u32 %s320_s21, 4  ;;  %s20_s25 = sshll.u32 %s388_s2, 4  ;;  %s36_s22 = int_to_ptr.vmem [resolvable:$true] %s35_s22  ;;  %s21_s25 = int_to_ptr.hbm [resolvable:$true] %s20_s25 }
   0x3   :  { %s321_s26 = smov 128   ;;  %s322_s27 = smov 8  }
   0x4   :  { %41 = dma.hbm_to_vmem [thread:$0]  %s34_s20, 2048, %s36_s22, [#allocation5], %s321_s26, %s321_s26, %s322_s27  }
   0x5   :  { %s323_s28 = smov [#allocation2]   ;;  %s46_s7 = sshll.u32 %s390_s4, 4  ;;  %s47_s7 = int_to_ptr.hbm [resolvable:$true] %s46_s7 }
   0x6   :  { %s22_s29 = sshll.u32 %s323_s28, 4  ;;  %s324_s3 = smov [#allocation6]   ;;  %s23_s29 = int_to_ptr.vmem [resolvable:$true] %s22_s29 }
   0x7   :  { %28 = dma.hbm_to_vmem [thread:$0]  %s21_s25, 2048, %s23_s29, [#allocation3], %s321_s26, %s321_s26, %s322_s27  }
   0x8   :  { %s48_s8 = sshll.u32 %s324_s3, 4  ;;  %s49_s8 = int_to_ptr.vmem [resolvable:$true] %s48_s8 }
   0x9   :  { %54 = dma.hbm_to_vmem [thread:$0]  %s47_s7, 2048, %s49_s8, [#allocation5], %s321_s26, %s321_s26, %s322_s27  }
   0xa   :  { %316 = dma.done.wait [#allocation3], 2048  }
   0xb   :  { %317 = vsyncadd [#allocation3], 4294965248 }
   0xc   :  { %318 = dma.done.wait [#allocation5], 4096  }
   0xd   :  { %319 = vsyncadd [#allocation5], 4294963200  ;;  %v325_v0 = vmov 0   ;;  %v68_v1 = vld [vmem:[%s386_s0] sm:$0xff]  ;;  %v102_v2 = vld [vmem:[#allocation2 + $0x78] sm:$0xff]  ;;  %v326_v7 = vmov 1   ;;  %v69_v25 = vlaneseq }
   0xe   :  { %234 = vset.pattern.permute.xlu0 %v325_v0  ;;  %v101_v3 = vld [vmem:[#allocation2 + $0x70] sm:$0xff]  ;;  %104 = vmatpush.msra.mxu0 %v102_v2  ;;  %v100_v4 = vld [vmem:[#allocation2 + $0x68] sm:$0xff]  ;;  %v99_v5 = vld [vmem:[#allocation2 + $0x60] sm:$0xff]  ;;  %vm216_vm1 = vcmask 7168   ;;  %vm218_vm2 = vcmask 15360  }
   0xf   :  { %74 = vperm.xlu0 %234, %v68_v1   ;;  %v98_v6 = vld [vmem:[#allocation2 + $0x58] sm:$0xff]  ;;  %v97_v8 = vld [vmem:[#allocation2 + $0x50] sm:$0xff]  ;;  %v96_v9 = vld [vmem:[#allocation2 + $0x48] sm:$0xff]  ;;  %v70_v29 = vand.u32 127, %v69_v25 }
  0x10   :  { %105 = vmatpush.msra.mxu0 %v101_v3  ;;  %v95_v10 = vld [vmem:[#allocation2 + $0x40] sm:$0xff]  ;;  %v94_v11 = vld [vmem:[#allocation2 + $0x38] sm:$0xff]  ;;  %v93_v12 = vld [vmem:[#allocation2 + $0x30] sm:$0xff] }
  0x11   :  { %v92_v13 = vld [vmem:[#allocation2 + $0x28] sm:$0xff]  ;;  %v91_v14 = vld [vmem:[#allocation2 + $0x20] sm:$0xff]  ;;  %v90_v15 = vld [vmem:[#allocation2 + $0x18] sm:$0xff]  ;;  %vm71_vm0 = vcmp.lt.s32.totalorder %v70_v29, 64 }
  0x12   :  { %106 = vmatpush.msra.mxu0 %v100_v4  ;;  %v89_v16 = vld [vmem:[#allocation2 + $0x10] sm:$0xff]  ;;  %v88_v17 = vld [vmem:[#allocation2 + $0x8] sm:$0xff]  ;;  %v87_v18 = vld [vmem:[#allocation2] sm:$0xff] }
  0x13   :  { %v140_v19 = vld [vmem:[#allocation4 + $0x78] sm:$0xff]  ;;  %v139_v20 = vld [vmem:[#allocation4 + $0x70] sm:$0xff]  ;;  %v138_v21 = vld [vmem:[#allocation4 + $0x68] sm:$0xff] }
  0x14   :  { %107 = vmatpush.msra.mxu0 %v99_v5  ;;  %142 = vmatpush.msra.mxu1 %v140_v19  ;;  %v137_v22 = vld [vmem:[#allocation4 + $0x60] sm:$0xff]  ;;  %v136_v23 = vld [vmem:[#allocation4 + $0x58] sm:$0xff]  ;;  %v135_v24 = vld [vmem:[#allocation4 + $0x50] sm:$0xff] }
  0x15   :  { %v134_v27 = vld [vmem:[#allocation4 + $0x48] sm:$0xff]  ;;  %v133_v28 = vld [vmem:[#allocation4 + $0x40] sm:$0xff]  ;;  %v132_v31 = vld [vmem:[#allocation4 + $0x38] sm:$0xff] }
  0x16   :  { %108 = vmatpush.msra.mxu0 %v98_v6  ;;  %143 = vmatpush.msra.mxu1 %v139_v20  ;;  %v373_v30 = vld [vmem:[%s387_s1] sm:$0xff]  ;;  %v131_v32 = vld [vmem:[#allocation4 + $0x30] sm:$0xff]  ;;  %v130_v34 = vld [vmem:[#allocation4 + $0x28] sm:$0xff]  ;;  %s327_s1 = smov 1  }
  0x17   :  { %235 = vset.pattern.permute.xlu0 %v326_v7  ;;  %v82_v33 = vperm.slane %v373_v30, 0  ;;  %v84_v36 = vperm.slane %v373_v30, 1  ;;  %v129_v41 = vld [vmem:[#allocation4 + $0x20] sm:$0xff]  ;;  %v128_v42 = vld [vmem:[#allocation4 + $0x18] sm:$0xff]  ;;  %v127_v43 = vld [vmem:[#allocation4 + $0x10] sm:$0xff]  ;;  %v103_v57 = vperm.slane %v373_v30, 2 }
  0x18   :  { %78 = vperm.xlu0 %235, %v68_v1   ;;  %109 = vmatpush.msra.mxu0 %v97_v8  ;;  %v126_v44 = vld [vmem:[#allocation4 + $0x8] sm:$0xff]  ;;  %v125_v45 = vld [vmem:[#allocation4] sm:$0xff]  ;;  %v178_v46 = vld [vmem:[#allocation6 + $0x78] sm:$0xff]  ;;  %v141_v2 = vperm.slane %v373_v30, 3  ;;  %v179_v6 = vperm.slane %v373_v30, 4 }
  0x19   :  { %144 = vmatpush.msra.mxu1 %v138_v21  ;;  %v177_v47 = vld [vmem:[#allocation6 + $0x70] sm:$0xff]  ;;  %180 = vmatpush.msra.mxu2 %v178_v46  ;;  %v176_v48 = vld [vmem:[#allocation6 + $0x68] sm:$0xff]  ;;  %v175_v49 = vld [vmem:[#allocation6 + $0x60] sm:$0xff] }
  0x1a   :  { %110 = vmatpush.msra.mxu0 %v96_v9  ;;  %v174_v50 = vld [vmem:[#allocation6 + $0x58] sm:$0xff]  ;;  %v173_v51 = vld [vmem:[#allocation6 + $0x50] sm:$0xff]  ;;  %v172_v52 = vld [vmem:[#allocation6 + $0x48] sm:$0xff]  ;;  %v207_v9 = vperm.slane %v373_v30, 6 }
  0x1b   :  { %145 = vmatpush.msra.mxu1 %v137_v22  ;;  %181 = vmatpush.msra.mxu2 %v177_v47  ;;  %v171_v53 = vld [vmem:[#allocation6 + $0x40] sm:$0xff]  ;;  %v170_v54 = vld [vmem:[#allocation6 + $0x38] sm:$0xff]  ;;  %v169_v55 = vld [vmem:[#allocation6 + $0x30] sm:$0xff] }
  0x1c   :  { %111 = vmatpush.msra.mxu0 %v95_v10  ;;  %v168_v56 = vld [vmem:[#allocation6 + $0x28] sm:$0xff]  ;;  %v167_v61 = vld [vmem:[#allocation6 + $0x20] sm:$0xff]  ;;  %v166_v62 = vld [vmem:[#allocation6 + $0x18] sm:$0xff] }
  0x1d   :  { %146 = vmatpush.msra.mxu1 %v136_v23  ;;  %182 = vmatpush.msra.mxu2 %v176_v48  ;;  %v165_v63 = vld [vmem:[#allocation6 + $0x10] sm:$0xff]  ;;  %v164_v0 = vld [vmem:[#allocation6 + $0x8] sm:$0xff]  ;;  %v163_v1 = vld [vmem:[#allocation6] sm:$0xff] }
  0x1e   :  { %112 = vmatpush.msra.mxu0 %v94_v11 }
  0x1f   :  { %147 = vmatpush.msra.mxu1 %v135_v24  ;;  %183 = vmatpush.msra.mxu2 %v175_v49 }
  0x20   :  { %113 = vmatpush.msra.mxu0 %v93_v12  ;;  %v201_v12 = vperm.slane %v373_v30, 5 }
  0x21   :  { %148 = vmatpush.msra.mxu1 %v134_v27  ;;  %184 = vmatpush.msra.mxu2 %v174_v50 }
  0x22   :  { %114 = vmatpush.msra.mxu0 %v92_v13 }
  0x23   :  { %149 = vmatpush.msra.mxu1 %v133_v28  ;;  %185 = vmatpush.msra.mxu2 %v173_v51 }
  0x24   :  { %115 = vmatpush.msra.mxu0 %v91_v14  ;;  %v205_v14 = vperm.slane %v373_v30, 7 }
  0x25   :  { %150 = vmatpush.msra.mxu1 %v132_v31  ;;  %186 = vmatpush.msra.mxu2 %v172_v52 }
  0x26   :  { %116 = vmatpush.msra.mxu0 %v90_v15 }
  0x27   :  { %151 = vmatpush.msra.mxu1 %v131_v32  ;;  %187 = vmatpush.msra.mxu2 %v171_v53 }
  0x28   :  { %117 = vmatpush.msra.mxu0 %v89_v16 }
  0x29   :  { %152 = vmatpush.msra.mxu1 %v130_v34  ;;  %188 = vmatpush.msra.mxu2 %v170_v54 }
  0x2a   :  { %118 = vmatpush.msra.mxu0 %v88_v17 }
  0x2b   :  { %153 = vmatpush.msra.mxu1 %v129_v41  ;;  %189 = vmatpush.msra.mxu2 %v169_v55 }
  0x2c   :  { %119 = vmatpush.msra.mxu0 %v87_v18 }
  0x2d   :  { %154 = vmatpush.msra.mxu1 %v128_v42  ;;  %190 = vmatpush.msra.mxu2 %v168_v56 }
  0x2f   :  { %155 = vmatpush.msra.mxu1 %v127_v43  ;;  %191 = vmatpush.msra.mxu2 %v167_v61 }
  0x31   :  { %156 = vmatpush.msra.mxu1 %v126_v44  ;;  %192 = vmatpush.msra.mxu2 %v166_v62 }
  0x33   :  { %157 = vmatpush.msra.mxu1 %v125_v45  ;;  %193 = vmatpush.msra.mxu2 %v165_v63 }
  0x35   :  { %194 = vmatpush.msra.mxu2 %v164_v0 }
  0x37   :  { %195 = vmatpush.msra.mxu2 %v163_v1 }
  0x81   :  { %v75_v26 = vpop.permute.xlu0 %74 }
  0x8a   :  { %v79_v35 = vpop.permute.xlu0 %78 }
  0x8b   :  { %v81_v37 = vsel %vm71_vm0, %v75_v26, %v79_v35 }
  0x8c   :  { %v83_v38 = vmul.f32 %v82_v33, %v81_v37 }
  0x8e   :  { %v85_v39 = vadd.f32 %v84_v36, %v83_v38 }
  0x90   :  { %236 = vtanh.f32 %v85_v39 }
  0x96   :  { %v237_v40 = vpop.eup %236 }
  0x97   :  { %120 = vmatmul.f32.vlgmr.msra.gmra.mxu0 %v237_v40 }
 0x114   :  { %v121_v58 = vpop.f32.mrf.mxu0 }
 0x115   :  { %v122_v59 = vadd.f32 %v121_v58, %v103_v57 }
 0x117   :  { %238 = vtanh.f32 %v122_v59 }
 0x11d   :  { %v239_v60 = vpop.eup %238 }
 0x11e   :  { %158 = vmatmul.f32.vlgmr.msra.gmra.mxu1 %v239_v60 }
 0x19b   :  { %v159_v3 = vpop.f32.mrf.mxu1 }
 0x19c   :  { %v160_v4 = vadd.f32 %v159_v3, %v141_v2 }
 0x19e   :  { %240 = vtanh.f32 %v160_v4 }
 0x1a4   :  { %v241_v5 = vpop.eup %240 }
 0x1a5   :  { %196 = vmatmul.f32.vlgmr.msra.gmra.mxu2 %v241_v5 }
 0x228   :  { %v197_v7 = vpop.f32.mrf.mxu2 }
 0x229   :  { %v198_v8 = vadd.f32 %v197_v7, %v179_v6 }
 0x22b   :  { %242 = vtanh.f32 %v198_v8 }
 0x231   :  { %v243_v10 = vpop.eup %242 }
 0x232   :  { %v208_v11 = vmul.f32 %v243_v10, %v207_v9  ;;  %v202_v13 = vmul.f32 %v243_v10, %v201_v12 }
 0x234   :  { %209 = vadd.xlane.f32.xlu1 %v208_v11 }
 0x23c   :  { %203 = vadd.xlane.f32.xlu1 %v202_v13 }
 0x2a7   :  { %v210_v15 = vpop.xlane.xlu1 %209 }
 0x2a8   :  { %v211_v16 = vadd.f32 %v210_v15, %v205_v14 }
 0x2aa   :  { %213 = vrot.lane.b32.xlu2 %v211_v16, %s327_s1 }
 0x2af   :  { %v204_v17 = vpop.xlane.xlu1 %203 }
 0x2b0   :  { %v206_v18 = vadd.f32 %v205_v14, %v204_v17 }
 0x304   :  { %v214_v19 = vpop.permute.xlu2 %213 }
 0x305   :  { %v217_v20 = vsel %vm216_vm1, %v206_v18, %v214_v19 }
 0x306   :  { %219 = vst.msk [vmem:[%s391_s5] sm:$0xff] %vm218_vm2, %v217_v20 }
 0x307   :  { %224 = vsyncpa [#allocation3], 1 }
 0x308   :  { %225 = vsyncpa [#allocation5], 1 }

</bundles_post_ra>
